<compile_context>
chip_gen: v5e
topology: v5e:2x2
jax: 0.10.0
libtpu: 0.0.40
codegen_flags: <defaults>
</compile_context>

<pallas_src>
import numpy as np

import jax
import jax.numpy as jnp
from jax import lax
from jax.experimental import pallas as pl
from jax.experimental.pallas import tpu as pltpu

NORM_EPS = 1e-5
VMEM_LIMIT = 32 * 1024 * 1024   # sized against v7x's 64 MiB physical VMEM


# -------------------- kernel 1: K/V precompute (per batch) --------------------
def _make_kv_kernel(N, C, N_kv, n_ratio):
    def kernel(x_ref, wkv_ref, bkv_ref, kv_ref):
        x = x_ref[0]                                           # (N, C)
        if n_ratio > 1:
            # AvgPool1d(kernel=stride=n_ratio) over the sequence axis.
            x = jnp.mean(x.reshape(N_kv, n_ratio, C), axis=1)
        # Eval-mode BatchNorm is already folded into wkv/bkv by the wrapper.
        kv = jnp.dot(x.astype(jnp.bfloat16), wkv_ref[...],
                     preferred_element_type=jnp.float32) + bkv_ref[...]
        kv_ref[0] = kv.astype(jnp.bfloat16)                    # (N_kv, 2C)
    return kernel


# ---------------- kernel 2: attention + fused output projection ---------------
def _make_attn_kernel(C, N_kv, num_heads, head_dim, out_dim, TQ):
    def kernel(xq_ref, kv_ref, wq_ref, bq_ref, wp_ref, bp_ref, o_ref, ctx_ref):
        # Q projection (qk scale pre-folded into wq/bq); cast to bf16 once.
        q = (jnp.dot(xq_ref[0].astype(jnp.bfloat16), wq_ref[...],
                     preferred_element_type=jnp.float32)
             + bq_ref[...]).astype(jnp.bfloat16)               # (TQ, C)

        for h in range(num_heads):
            lo = h * head_dim
            qh = q[:, lo:lo + head_dim]                        # (TQ, hd) bf16
            kh = kv_ref[0, :, lo:lo + head_dim]                # (N_kv, hd) bf16
            vh = kv_ref[0, :, C + lo:C + lo + head_dim]        # (N_kv, hd) bf16
            # q @ k^T without an explicit transpose: contract the last dims.
            logits = lax.dot_general(
                qh, kh, dimension_numbers=(((1,), (1,)), ((), ())),
                preferred_element_type=jnp.float32)            # (TQ, N_kv) f32
            logits = logits - jnp.max(logits, axis=-1, keepdims=True)
            p = jnp.exp(logits)
            inv = pl.reciprocal(jnp.sum(p, axis=-1, keepdims=True), approx=True)
            # Normalize AFTER the PV matmul: (TQ, hd) multiply, not (TQ, N_kv).
            ctx_h = jnp.dot(p.astype(jnp.bfloat16), vh,
                            preferred_element_type=jnp.float32)  # (TQ, hd) f32
            ctx_ref[:, lo:lo + head_dim] = (ctx_h * inv).astype(jnp.bfloat16)

        # One fused output projection over the full contraction depth C.
        o_ref[0] = (jnp.dot(ctx_ref[...], wp_ref[...],
                            preferred_element_type=jnp.float32)
                    + bp_ref[...]).astype(o_ref.dtype)
    return kernel


def _pick_q_tile(N, target=256):
    """Largest tile dividing N, preferring multiples of 16 (bf16 packing), <= target."""
    if N <= target:
        return N
    for step in (16, 8):
        best = None
        for tq in range(step, target + 1, step):
            if N % tq == 0:
                best = tq
        if best is not None:
            return best
    return N


def e_mhsa_pallas(x, params, *, head_dim=32, sr_ratio=1, qk_scale=None, q_tile=None):
    """x: (B, N, C) float32 (or bfloat16).  params: dict of weights (see __main__)."""
    B, N, C = x.shape
    assert C % head_dim == 0, "C must be a multiple of head_dim"
    num_heads = C // head_dim
    scale = qk_scale if qk_scale is not None else head_dim ** (-0.5)
    n_ratio = sr_ratio * sr_ratio
    if sr_ratio > 1:
        assert N % n_ratio == 0, "N must be a multiple of sr_ratio**2"
    N_kv = N // n_ratio if sr_ratio > 1 else N
    out_dim = params["wp"].shape[1]

    TQ = q_tile if q_tile is not None else _pick_q_tile(N)
    assert N % TQ == 0, "q_tile must divide N"

    # Fold the qk scale into the Q projection (exact: scale*(q@k) == (scale*q)@k).
    wq = params["wq"] * scale
    bq = params["bq"] * scale

    # Fold eval-mode BatchNorm1d (running stats) into the K/V projections (exact).
    if sr_ratio > 1:
        inv_std = 1.0 / jnp.sqrt(params["bn_var"] + NORM_EPS)
        g = params["bn_gamma"] * inv_std                       # (C,)
        shift = params["bn_beta"] - params["bn_mean"] * g      # (C,)
        wk = g[:, None] * params["wk"]
        bk = params["bk"] + (shift @ params["wk"])[None, :]
        wv = g[:, None] * params["wv"]
        bv = params["bv"] + (shift @ params["wv"])[None, :]
    else:
        wk, bk = params["wk"], params["bk"]
        wv, bv = params["wv"], params["bv"]

    # Fuse K|V into one (C, 2C) weight; MXU operands bf16, biases f32.
    wq_b = wq.astype(jnp.bfloat16)
    wkv_b = jnp.concatenate([wk, wv], axis=1).astype(jnp.bfloat16)   # (C, 2C)
    wp_b = params["wp"].astype(jnp.bfloat16)
    bq_f = bq.astype(jnp.float32)
    bkv_f = jnp.concatenate([bk, bv], axis=1).astype(jnp.float32)    # (1, 2C)
    bp_f = params["bp"].astype(jnp.float32)

    # ---- kernel 1: K/V precompute (pool + BN-folded projection) per batch ----
    kv_kernel = _make_kv_kernel(N, C, N_kv, n_ratio)
    kv = pl.pallas_call(
        kv_kernel,
        out_shape=jax.ShapeDtypeStruct((B, N_kv, 2 * C), jnp.bfloat16),
        grid=(B,),
        in_specs=[
            pl.BlockSpec((1, N, C), lambda b: (b, 0, 0)),
            pl.BlockSpec((C, 2 * C), lambda b: (0, 0)),
            pl.BlockSpec((1, 2 * C), lambda b: (0, 0)),
        ],
        out_specs=pl.BlockSpec((1, N_kv, 2 * C), lambda b: (b, 0, 0)),
        compiler_params=pltpu.CompilerParams(
            dimension_semantics=("parallel",),
            vmem_limit_bytes=VMEM_LIMIT),
    )(x, wkv_b, bkv_f)

    # ---- kernel 2: attention + fused proj over a (batch, q-tile) grid --------
    attn_kernel = _make_attn_kernel(C, N_kv, num_heads, head_dim, out_dim, TQ)

    def const(shape):
        return pl.BlockSpec(shape, lambda b, t: (0,) * len(shape))

    return pl.pallas_call(
        attn_kernel,
        out_shape=jax.ShapeDtypeStruct((B, N, out_dim), jnp.float32),
        grid=(B, N // TQ),
        in_specs=[
            pl.BlockSpec((1, TQ, C), lambda b, t: (b, t, 0)),        # q-tile of x
            pl.BlockSpec((1, N_kv, 2 * C), lambda b, t: (b, 0, 0)),  # fused K|V (bf16)
            const((C, C)), const((1, C)),                            # wq, bq (scale folded)
            const((C, out_dim)), const((1, out_dim)),                # wp, bp
        ],
        out_specs=pl.BlockSpec((1, TQ, out_dim), lambda b, t: (b, t, 0)),
        scratch_shapes=[pltpu.VMEM((TQ, C), jnp.bfloat16)],          # per-head ctx slab
        compiler_params=pltpu.CompilerParams(
            dimension_semantics=("parallel", "parallel"),
            vmem_limit_bytes=VMEM_LIMIT),
    )(x, kv, wq_b, bq_f, wp_b, bp_f)


def e_mhsa_reference(x, params, *, head_dim=32, sr_ratio=1, qk_scale=None):
    """Plain-JAX f32 reference mirroring the PyTorch forward (eval mode)."""
    B, N, C = x.shape
    num_heads = C // head_dim
    scale = qk_scale if qk_scale is not None else head_dim ** (-0.5)
    n_ratio = sr_ratio * sr_ratio

    q = x @ params["wq"] + params["bq"][0]
    q = q.reshape(B, N, num_heads, head_dim).transpose(0, 2, 1, 3)

    if sr_ratio > 1:
        x_ = x.reshape(B, N // n_ratio, n_ratio, C).mean(axis=2)   # AvgPool1d over N
        inv_std = 1.0 / jnp.sqrt(params["bn_var"] + NORM_EPS)
        x_ = (x_ - params["bn_mean"]) * inv_std * params["bn_gamma"] + params["bn_beta"]
    else:
        x_ = x

    k = x_ @ params["wk"] + params["bk"][0]
    k = k.reshape(B, -1, num_heads, head_dim).transpose(0, 2, 3, 1)
    v = x_ @ params["wv"] + params["bv"][0]
    v = v.reshape(B, -1, num_heads, head_dim).transpose(0, 2, 1, 3)

    attn = jax.nn.softmax(jnp.einsum("bhnd,bhdk->bhnk", q, k) * scale, axis=-1)
    out = jnp.einsum("bhnk,bhkd->bhnd", attn, v).transpose(0, 2, 1, 3).reshape(B, N, C)
    return out @ params["wp"] + params["bp"][0]


if __name__ == "__main__":
    # Small, E_MHSA-consistent shapes: dim=64, head_dim=32 -> 2 heads,
    # N = 8*8 = 64 spatial tokens.  Test both the sr_ratio>1 (pool+BN) path
    # (key/value length 16) and the sr_ratio==1 path, with 2 query tiles each.
    B, N, C = 2, 64, 64
    head_dim = 32
    out_dim = C

    key = jax.random.PRNGKey(0)
    ks = jax.random.split(key, 12)

    def init(k, shape, s=0.05):
        return (s * jax.random.normal(k, shape)).astype(jnp.float32)

    params = {
        "wq": init(ks[0], (C, C)), "bq": init(ks[1], (1, C)),
        "wk": init(ks[2], (C, C)), "bk": init(ks[3], (1, C)),
        "wv": init(ks[4], (C, C)), "bv": init(ks[5], (1, C)),
        "wp": init(ks[6], (C, out_dim)), "bp": init(ks[7], (1, out_dim)),
        # BatchNorm1d(dim) running stats + affine (eval-mode semantics).
        "bn_gamma": (1.0 + 0.1 * jax.random.normal(ks[8], (C,))).astype(jnp.float32),
        "bn_beta": (0.1 * jax.random.normal(ks[9], (C,))).astype(jnp.float32),
        "bn_mean": (0.05 * jax.random.normal(ks[10], (C,))).astype(jnp.float32),
        "bn_var": jnp.abs(1.0 + 0.1 * jax.random.normal(ks[11], (C,))).astype(jnp.float32),
    }

    x = jax.random.normal(jax.random.PRNGKey(42), (B, N, C), dtype=jnp.float32)

    for sr in (2, 1):
        out = e_mhsa_pallas(x, params, head_dim=head_dim, sr_ratio=sr, q_tile=32)
        out = jax.block_until_ready(out)
        ref = e_mhsa_reference(x, params, head_dim=head_dim, sr_ratio=sr)
        # bf16 MXU operands + approx reciprocal -> relaxed tolerance vs f32 reference.
        np.testing.assert_allclose(np.asarray(out), np.asarray(ref),
                                   rtol=2e-2, atol=2e-2)

    print("KERNEL_OK")
</pallas_src>

<mosaic_0001>
module attributes {stable_mosaic.version = 11 : i64} {
  func.func @kernel(%arg0: i32, %arg1: memref<1x64x64xf32, #tpu.memory_space<vmem>>, %arg2: memref<64x128xbf16, #tpu.memory_space<vmem>>, %arg3: memref<1x128xf32, #tpu.memory_space<vmem>>, %arg4: memref<1x16x128xbf16, #tpu.memory_space<vmem>>) attributes {dimension_semantics = [#tpu.dimension_semantics<parallel>], iteration_bounds = array<i64: 2>, scalar_prefetch = 0 : i64, scratch_operands = 0 : i64, tpu.core_type = #tpu.core_type<tc>, window_params = [{transform_indices = @transform_0, window_bounds = array<i64: 1, 64, 64>}, {pipeline_mode = #tpu.pipeline_mode<synchronous>, transform_indices = @transform_1, window_bounds = array<i64: 64, 128>}, {pipeline_mode = #tpu.pipeline_mode<synchronous>, transform_indices = @transform_2, window_bounds = array<i64: 1, 128>}, {transform_indices = @transform_3, window_bounds = array<i64: 1, 16, 128>}]} {
    %c0 = arith.constant 0 : index
    %c0_0 = arith.constant 0 : index
    %c0_1 = arith.constant 0 : index
    %0 = vector.load %arg1[%c0, %c0_0, %c0_1] : memref<1x64x64xf32, #tpu.memory_space<vmem>>, vector<1x64x64xf32>
    %1 = vector.shape_cast %0 : vector<1x64x64xf32> to vector<64x64xf32>
    %2 = vector.shape_cast %1 : vector<64x64xf32> to vector<16x4x64xf32>
    %cst = arith.constant dense<0.000000e+00> : vector<16x64xf32>
    %3 = vector.multi_reduction <add>, %2, %cst [1] : vector<16x4x64xf32> to vector<16x64xf32>
    %cst_2 = arith.constant 4.000000e+00 : f32
    %4 = vector.broadcast %cst_2 : f32 to vector<16x64xf32>
    %5 = arith.divf %3, %4 : vector<16x64xf32>
    %6 = arith.truncf %5 : vector<16x64xf32> to vector<16x64xbf16>
    %c0_3 = arith.constant 0 : index
    %c0_4 = arith.constant 0 : index
    %7 = vector.load %arg2[%c0_3, %c0_4] : memref<64x128xbf16, #tpu.memory_space<vmem>>, vector<64x128xbf16>
    %cst_5 = arith.constant dense<0.000000e+00> : vector<16x128xf32>
    %8 = tpu.matmul %6, %7, %cst_5 {dimension_numbers = #tpu.dot_dimension_numbers<[1], [0], [0], [1], [0, 0, 1, 1], [], []>} : vector<16x64xbf16>, vector<64x128xbf16>, vector<16x128xf32> -> vector<16x128xf32>
    %c0_6 = arith.constant 0 : index
    %c0_7 = arith.constant 0 : index
    %9 = vector.load %arg3[%c0_6, %c0_7] : memref<1x128xf32, #tpu.memory_space<vmem>>, vector<1x128xf32>
    %10 = vector.broadcast %9 : vector<1x128xf32> to vector<16x128xf32>
    %11 = arith.addf %8, %10 : vector<16x128xf32>
    %12 = arith.truncf %11 : vector<16x128xf32> to vector<16x128xbf16>
    %c0_8 = arith.constant 0 : index
    %c0_9 = arith.constant 0 : index
    %c0_10 = arith.constant 0 : index
    %13 = vector.load %arg4[%c0_8, %c0_9, %c0_10] : memref<1x16x128xbf16, #tpu.memory_space<vmem>>, vector<1x16x128xbf16>
    %14 = vector.shape_cast %13 : vector<1x16x128xbf16> to vector<16x128xbf16>
    %15 = vector.shape_cast %12 : vector<16x128xbf16> to vector<1x16x128xbf16>
    tpu.vector_store %arg4[%c0_8, %c0_9, %c0_10], %15 {strides = array<i32>} : memref<1x16x128xbf16, #tpu.memory_space<vmem>>, vector<1x16x128xbf16>,
    return
  }
  func.func @transform_0(%arg0: i32) -> (i32, i32, i32) {
    %c0_i32 = arith.constant 0 : i32
    %c0_i32_0 = arith.constant 0 : i32
    %c0_i32_1 = arith.constant 0 : i32
    return %arg0, %c0_i32, %c0_i32_0 : i32, i32, i32
  }
  func.func @transform_1(%arg0: i32) -> (i32, i32) {
    %c0_i32 = arith.constant 0 : i32
    %c0_i32_0 = arith.constant 0 : i32
    %c0_i32_1 = arith.constant 0 : i32
    return %c0_i32, %c0_i32_0 : i32, i32
  }
  func.func @transform_2(%arg0: i32) -> (i32, i32) {
    %c0_i32 = arith.constant 0 : i32
    %c0_i32_0 = arith.constant 0 : i32
    %c0_i32_1 = arith.constant 0 : i32
    return %c0_i32, %c0_i32_0 : i32, i32
  }
  func.func @transform_3(%arg0: i32) -> (i32, i32, i32) {
    %c0_i32 = arith.constant 0 : i32
    %c0_i32_0 = arith.constant 0 : i32
    %c0_i32_1 = arith.constant 0 : i32
    return %arg0, %c0_i32, %c0_i32_0 : i32, i32, i32
  }
}

</mosaic_0001>

<bundles_post_ra>
// kernel: tpu_custom_call.1
= control target key start
LH: loop header
LB: loop body
LE: loop exit
PB: predicated region body
PF: predicated region fallthrough
CT: control target
= control target key end

     0   :  { %8 = vsyncpa [#allocation3], 0  ;;  %s1081_s0 = inlined_call_operand.hbm [shape: f32[2,64,64], index: 0, kind: input, shape index: {}]   ;;  %s1082_s1 = inlined_call_operand.hbm [shape: bf16[64,128], index: 1, kind: input, shape index: {}]   ;;  %s1083_s2 = inlined_call_operand.vmem [shape: f32[1,128], index: 2, kind: input, shape index: {}]   ;;  %s1084_s3 = inlined_call_operand.hbm [shape: bf16[2,16,128], index: 3, kind: output, shape index: {}]  }
   0x1   :  { %10 = vsyncpa [#allocation3 + $0x1], 0 }
   0x2   :  { %11 = vsyncpa [#allocation6], 0 }
   0x3   :  { %12 = vsyncpa [#allocation4], 0 }
   0x4   :  { %14 = vsyncpa [#allocation4 + $0x1], 0  ;;  %s875_s12 = smov 0   ;;  %s877_s13 = smov 0  }
   0x5   :  { %s879_s14 = smov 0   ;;  %s881_s15 = smov 0  }
   0x6 LB: > { %s896_s16 = sadd.s32 4294967295, %s845_s15   ;;  %s604_s17 = sadd.s32 4294967294, %s845_s15   ;;  %s845_s15 = sphi %s881_s15, %s1094_s15   ;;  %s841_s14 = sphi %s879_s14, %s1093_s14   ;;  %s837_s13 = sphi %s877_s13, %s1092_s13   ;;  %s833_s12 = sphi %s875_s12, %s1091_s12  }
   0x7   : > { %p40_p0 = scmp.ne.s32.totalorder %s837_s13, %s833_s12  ;;  %p41_p1 = scmp.eq.s32.totalorder %s896_s16, 0 }
   0x8   : > { %p106_p2 = scmp.eq.s32.totalorder %s896_s16, 1  ;;  %p112_p3 = scmp.eq.s32.totalorder %s604_s17, 1 }
   0x9   : > { %p905_p4 = por %p41_p1, %p40_p0  ;;  %p605_p5 = scmp.ge.s32.totalorder %s845_s15, 1 }
   0xa   : > { %p910_p6 = por %p112_p3, %p40_p0  ;;  %p119_p7 = scmp.lt.s32.totalorder %s845_s15, 3 }
   0xb   : > { %s130_s22 = sshll.u32 %s1082_s1, 4  ;;  %s847_s24 = smov [#allocation5]   ;;  %s131_s22 = int_to_ptr.hbm [resolvable:$true] %s130_s22 }
   0xc   : > { %p918_p8 = pnand %p605_p5, %p119_p7  ;;  %s132_s25 = sshll.u32 %s847_s24, 4  ;;  %s133_s25 = int_to_ptr.vmem [resolvable:$true] %s132_s25 }
   0xd   : > { %s928_s26 = sadd.s32 1, %s845_s15   ;;  %s848_s27 = smov 64  }
   0xe   : > { %p656_p9 = pneg %p918_p8  ;;  %s849_s28 = smov 4  }
   0xf   : > { %s24_s29 = ssub.s32 %s845_s15, %s928_s26  ;;  %s27_s30 = sadd.s32 1, %s841_s14 }
  0x10   : > { %p657_p10 = pnand %p656_p9, %p41_p1  ;;  %p25_p12 = scmp.eq.s32.totalorder %s24_s29, 0 }
  0x11   : > { %p34_p13 = scmp.ne.s32.totalorder %s841_s14, %s837_s13  ;;  %p35_p0 = scmp.eq.s32.totalorder %s845_s15, 0 }
  0x12   : > { %659 = dma.hbm_to_vmem [thread:$0]  (!%p657_p10), %s131_s22, 512, %s133_s25, [#allocation6], %s848_s27, %s848_s27, %s849_s28  }
  0x13   : > { %p669_p3 = scmp.lt.s32.totalorder %s845_s15, 2  ;;  %p36_p5 = por %p35_p0, %p34_p13 }
  0x14   : > { %s938_s4 = scalar_select %p25_p12, %s841_s14, %s27_s30  }
  0x15   : > { %p942_p7 = por %p106_p2, %p34_p13  ;;  %s149_s6 = sand.u32 1, %s841_s14  }
  0x16   : > { %s637_s7 = sshll.u32 %s845_s15, 6  ;;  %s608_s8 = sshll.u32 %s149_s6, 6 }
  0x17   : > { %s158_s11 = scalar_lea.hbm %s1081_s0, %s637_s7  ;;  %s153_s20 = scalar_lea.vmem [#allocation2], %s608_s8 }
  0x18   : > { %s159_s17 = sshll.u32 %s158_s11, 4  ;;  %s161_s21 = sshll.u32 %s153_s20, 4  ;;  %s160_s17 = int_to_ptr.hbm [resolvable:$true] %s159_s17  ;;  %s162_s21 = int_to_ptr.vmem [resolvable:$true] %s161_s21 }
  0x19   : > { %p953_p9 = pnand %p669_p3, %p36_p5  ;;  %s150_s24 = scalar_lea.sflag [#allocation3], %s149_s6 }
  0x1a   : > { %s745_s25 = sshra.s32 %s160_s17, 4  ;;  %s752_s30 = scalar_lea.hbm %s1081_s0, 128  ;;  %s746_s25 = int_to_ptr.hbm [resolvable:$true] %s745_s25 }
  0x1b   : > { %s747_s27 = scalar_lea.hbm %s746_s25, 64  ;;  %p749_p10 = pneg %p953_p9 }
  0x1c   : > { %p748_p2 = scmp.ne.s32.totalorder %s746_s25, %s747_s27  ;;  %p753_p0 = scmp.lt.s32.totalorder %s746_s25, %s1081_s0 }
  0x1d   : > { %p754_p3 = scmp.lt.s32.totalorder %s752_s30, %s747_s27 }
  0x1e   : > { %p750_p12 = pnand %p749_p10, %p748_p2 }
  0x1f   : > { %p755_p5 = por %p754_p3, %p753_p0 }
  0x20   : > { %p751_p13 = pneg %p750_p12 }
  0x22   : > { %p756_p11 = pnand %p755_p5, %p751_p13 }
  0x24   : > { %759 = shalt.err (!%p756_p11)
}
  0x25   : > { %s850_s6 = smov 128   ;;  %s851_s9 = smov 8  }
  0x26   : > { %663 = dma.hbm_to_vmem [thread:$0]  (!%p953_p9), %s160_s17, 1024, %s162_s21, %s150_s24, %s850_s6, %s850_s6, %s851_s9  }
  0x27   : > { %173 = sbr.rel (%p918_p8) target bundleno = 243 (0xf3), region = 32  ;;  %s970_s10 = sand.u32 (!%p918_p8), 1, %s837_s13  }
  0x28   : > { %s612_s11 = sshll.u32 (!%p918_p8), %s970_s10, 6  ;;  %s176_s20 = scalar_lea.sflag (!%p918_p8), [#allocation3], %s970_s10 }
  0x29   : > { %s974_s25 = scalar_lea.vmem (!%p918_p8), [#allocation2], %s612_s11 }
  0x2c   : > { %820 = dma.done.wait (%p905_p4), %s176_s20, 1024  }
  0x2d   : > { %822 = vsyncadd (%p905_p4), %s176_s20, 4294966272 }
  0x2e   : > { %824 = dma.done.wait (%p41_p1), [#allocation6], 512  }
  0x2f   : > { %826 = vsyncadd (%p41_p1), [#allocation6], 4294966784  ;;  %vm241_vm0 = vcmask 519168   ;;  %v641_v0 = vld [vmem:[#allocation5 + $0x18] sm:$0xff]  ;;  %v209_v1 = vld [vmem:[%s974_s25] sm:$0xff]  ;;  %v852_v12 = vmov 4.0  }
  0x30   : > { %v210_v2 = vld [vmem:[%s974_s25 + $0x8] sm:$0xff]  ;;  %491 = vmatpush.bf16.msra.mxu0 %v641_v0  ;;  %v640_v3 = vld [vmem:[#allocation5 + $0x10] sm:$0xff]  ;;  %v212_v5 = vld [vmem:[%s974_s25 + $0x18] sm:$0xff]  ;;  %v225_v6 = vrot.slane %v209_v1, 4  ;;  %v242_v8 = vsel %vm241_vm0, %v209_v1, 0.0  ;;  %713 = vrcp.f32 %v852_v12  ;;  %vm437_vm2 = vcmask 1041409  }
  0x31   : > { %v211_v4 = vld [vmem:[%s974_s25 + $0x10] sm:$0xff]  ;;  %v226_v7 = vrot.slane %v210_v2, 4  ;;  %v228_v10 = vrot.slane %v212_v5, 4  ;;  %v243_v11 = vrot.slane %v242_v8, 4  ;;  %v256_v14 = vsel %vm241_vm0, %v210_v2, 0.0  ;;  %v639_v17 = vld [vmem:[#allocation5 + $0x8] sm:$0xff] }
  0x32   : > { %v227_v9 = vrot.slane %v211_v4, 4  ;;  %v249_v13 = vsel %vm241_vm0, %v225_v6, 0.0  ;;  %v270_v16 = vsel %vm241_vm0, %v211_v4, 0.0  ;;  %v257_v20 = vrot.slane %v256_v14, 4  ;;  %v638_v32 = vld [vmem:[#allocation5] sm:$0xff]  ;;  %v214_v34 = vld [vmem:[%s974_s25 + $0x28] sm:$0xff] }
  0x33   : > { %v263_v15 = vsel %vm241_vm0, %v226_v7, 0.0  ;;  %v244_v18 = vadd.f32 %v243_v11, %v242_v8  ;;  %v250_v19 = vrot.slane %v249_v13, 4  ;;  %v271_v22 = vrot.slane %v270_v16, 4  ;;  %v213_v33 = vld [vmem:[%s974_s25 + $0x20] sm:$0xff]  ;;  %v215_v39 = vld [vmem:[%s974_s25 + $0x30] sm:$0xff]  ;;  %v216_v40 = vld [vmem:[%s974_s25 + $0x38] sm:$0xff] }
  0x34   : > { %492 = vmatpush.bf16.msra.mxu0 %v640_v3  ;;  %v264_v21 = vrot.slane %v263_v15, 4  ;;  %v277_v24 = vsel %vm241_vm0, %v227_v9, 0.0  ;;  %v284_v25 = vsel %vm241_vm0, %v212_v5, 0.0  ;;  %v291_v26 = vsel %vm241_vm0, %v228_v10, 0.0  ;;  %s614_s18 = sshll.u32 %s970_s10, 3  ;;  %s642_s23 = sshll.u32 %s896_s16, 3 }
  0x35   : > { %v245_v23 = vrot.slane %v244_v18, 2  ;;  %v251_v27 = vadd.f32 %v250_v19, %v249_v13  ;;  %v258_v28 = vadd.f32 %v257_v20, %v256_v14  ;;  %v272_v30 = vadd.f32 %v271_v22, %v270_v16  ;;  %s517_s22 = scalar_lea.hbm %s1084_s3, %s642_s23  ;;  %s207_s28 = scalar_lea.vmem [#allocation7], %s614_s18 }
  0x36   : > { %v265_v29 = vadd.f32 %v264_v21, %v263_v15  ;;  %v996_v31 = vpop.eup %713  ;;  %v278_v35 = vrot.slane %v277_v24, 4  ;;  %v285_v36 = vrot.slane %v284_v25, 4  ;;  %v292_v37 = vrot.slane %v291_v26, 4  ;;  %s518_s29 = sshll.u32 %s207_s28, 4  ;;  %s520_s30 = sshll.u32 %s517_s22, 4  ;;  %s519_s29 = int_to_ptr.vmem [resolvable:$true] %s518_s29  ;;  %s521_s30 = int_to_ptr.hbm [resolvable:$true] %s520_s30 }
  0x37   : > { %v246_v38 = vadd.f32 %v245_v23, %v244_v18  ;;  %v252_v41 = vrot.slane %v251_v27, 2  ;;  %v259_v42 = vrot.slane %v258_v28, 2  ;;  %v273_v44 = vrot.slane %v272_v30, 2  ;;  %s506_s16 = scalar_lea.sflag [#allocation4], %s970_s10  ;;  %s789_s7 = sshra.s32 %s521_s30, 4  ;;  %s790_s7 = int_to_ptr.hbm [resolvable:$true] %s789_s7 }
  0x38   : > { %493 = vmatpush.bf16.msra.mxu0 %v639_v17  ;;  %v266_v43 = vrot.slane %v265_v29, 2  ;;  %v229_v45 = vrot.slane %v213_v33, 4  ;;  %v230_v46 = vrot.slane %v214_v34, 4  ;;  %v279_v47 = vadd.f32 %v278_v35, %v277_v24  ;;  %s791_s8 = scalar_lea.hbm %s790_s7, 8  ;;  %s795_s11 = scalar_lea.hbm %s1084_s3, 16 }
  0x39   : > { %v286_v48 = vadd.f32 %v285_v36, %v284_v25  ;;  %v293_v49 = vadd.f32 %v292_v37, %v291_v26  ;;  %v1003_v50 = vmul.f32 4.0, %v996_v31  ;;  %v231_v51 = vrot.slane %v215_v39, 4  ;;  %p792_p1 = scmp.ne.s32.totalorder %s790_s7, %s791_s8  ;;  %p796_p11 = scmp.lt.s32.totalorder %s790_s7, %s1084_s3 }
  0x3a   : > { %v232_v52 = vrot.slane %v216_v40, 4  ;;  %v247_v53 = vrot.slane %v246_v38, 1  ;;  %v298_v54 = vsel %vm241_vm0, %v213_v33, 0.0  ;;  %v253_v55 = vadd.f32 %v252_v41, %v251_v27  ;;  %p797_p9 = scmp.lt.s32.totalorder %s795_s11, %s791_s8 }
  0x3b   : > { %v1006_v56 = vadd.f32 %v259_v42, %v258_v28  ;;  %v1008_v57 = vadd.f32 %v266_v43, %v265_v29  ;;  %v1010_v58 = vadd.f32 %v273_v44, %v272_v30  ;;  %v299_v59 = vrot.slane %v298_v54, 4  ;;  %p793_p4 = pnand %p792_p1, %p942_p7 }
  0x3c   : > { %494 = vmatpush.bf16.msra.mxu0 %v638_v32  ;;  %v305_v60 = vsel %vm241_vm0, %v229_v45, 0.0  ;;  %v312_v61 = vsel %vm241_vm0, %v214_v34, 0.0  ;;  %v319_v62 = vsel %vm241_vm0, %v230_v46, 0.0  ;;  %v280_v63 = vrot.slane %v279_v47, 2  ;;  %p798_p2 = por %p797_p9, %p796_p11 }
  0x3d   : > { %v287_v0 = vrot.slane %v286_v48, 2  ;;  %v294_v1 = vrot.slane %v293_v49, 2  ;;  %v306_v2 = vrot.slane %v305_v60, 4  ;;  %v300_v3 = vadd.f32 %v299_v59, %v298_v54  ;;  %p794_p8 = pneg %p793_p4 }
  0x3e   : > { %v313_v4 = vrot.slane %v312_v61, 4  ;;  %v320_v5 = vrot.slane %v319_v62, 4  ;;  %v326_v6 = vsel %vm241_vm0, %v215_v39, 0.0  ;;  %v333_v9 = vsel %vm241_vm0, %v231_v51, 0.0 }
  0x3f   : > { %v307_v7 = vadd.f32 %v306_v2, %v305_v60  ;;  %v327_v8 = vrot.slane %v326_v6, 4  ;;  %v340_v10 = vsel %vm241_vm0, %v216_v40, 0.0  ;;  %v301_v11 = vrot.slane %v300_v3, 2  ;;  %p799_p10 = pnand %p798_p2, %p794_p8 }
  0x40   : > { %v314_v12 = vadd.f32 %v313_v4, %v312_v61  ;;  %v321_v13 = vadd.f32 %v320_v5, %v319_v62  ;;  %v334_v14 = vrot.slane %v333_v9, 4  ;;  %v341_v17 = vrot.slane %v340_v10, 4 }
  0x41   : > { %v308_v15 = vrot.slane %v307_v7, 2  ;;  %v328_v16 = vadd.f32 %v327_v8, %v326_v6  ;;  %v347_v18 = vsel %vm241_vm0, %v232_v52, 0.0  ;;  %v248_v19 = vadd.f32 %v247_v53, %v246_v38 }
  0x42   : > { %v315_v20 = vrot.slane %v314_v12, 2  ;;  %v322_v21 = vrot.slane %v321_v13, 2  ;;  %v335_v22 = vadd.f32 %v334_v14, %v333_v9  ;;  %v254_v23 = vrot.slane %v253_v55, 1 }
  0x43   : > { %v329_v24 = vrot.slane %v328_v16, 2  ;;  %v342_v25 = vadd.f32 %v341_v17, %v340_v10  ;;  %v348_v26 = vrot.slane %v347_v18, 4  ;;  %vm359_vm1 = vweird.f32 %v996_v31 }
  0x44   : > { %v261_v27 = vrot.slane %v1006_v56, 1  ;;  %v302_v28 = vadd.f32 %v301_v11, %v300_v3  ;;  %v309_v29 = vadd.f32 %v308_v15, %v307_v7  ;;  %v336_v30 = vrot.slane %v335_v22, 2 }
  0x45   : > { %v316_v32 = vadd.f32 %v315_v20, %v314_v12  ;;  %v323_v33 = vadd.f32 %v322_v21, %v321_v13  ;;  %v343_v34 = vrot.slane %v342_v25, 2  ;;  %v349_v35 = vadd.f32 %v348_v26, %v347_v18 }
  0x46   : > { %v268_v36 = vrot.slane %v1008_v57, 1  ;;  %v281_v37 = vadd.f32 %v280_v63, %v279_v47  ;;  %v288_v38 = vadd.f32 %v287_v0, %v286_v48  ;;  %v330_v39 = vadd.f32 %v329_v24, %v328_v16 }
  0x47   : > { %v275_v40 = vrot.slane %v1010_v58, 1  ;;  %v295_v41 = vadd.f32 %v294_v1, %v293_v49  ;;  %v337_v42 = vadd.f32 %v336_v30, %v335_v22  ;;  %v350_v43 = vrot.slane %v349_v35, 2 }
  0x48   : > { %v255_v44 = vadd.f32 %v254_v23, %v253_v55  ;;  %v303_v45 = vrot.slane %v302_v28, 1  ;;  %v344_v46 = vadd.f32 %v343_v34, %v342_v25  ;;  %v356_v51 = vsub.f32 1.0, %v1003_v50 }
  0x49   : > { %v310_v52 = vrot.slane %v309_v29, 1  ;;  %v317_v53 = vrot.slane %v316_v32, 1  ;;  %v324_v54 = vrot.slane %v323_v33, 1  ;;  %v351_v59 = vadd.f32 %v350_v43, %v349_v35 }
  0x4a   : > { %v282_v60 = vrot.slane %v281_v37, 1  ;;  %v289_v61 = vrot.slane %v288_v38, 1  ;;  %v331_v62 = vrot.slane %v330_v39, 1  ;;  %v357_v47 = vmul.f32 %v996_v31, %v356_v51 }
  0x4b   : > { %v262_v48 = vadd.f32 %v261_v27, %v1006_v56  ;;  %v269_v49 = vadd.f32 %v268_v36, %v1008_v57  ;;  %v296_v63 = vrot.slane %v295_v41, 1  ;;  %v338_v0 = vrot.slane %v337_v42, 1 }
  0x4c   : > { %v276_v55 = vadd.f32 %v275_v40, %v1010_v58  ;;  %v345_v1 = vrot.slane %v344_v46, 1  ;;  %v352_v2 = vrot.slane %v351_v59, 1  ;;  %v358_v50 = vadd.f32 %v996_v31, %v357_v47 }
  0x4d   : > { %v304_v3 = vadd.f32 %v303_v45, %v302_v28  ;;  %v311_v4 = vadd.f32 %v310_v52, %v309_v29  ;;  %v318_v5 = vadd.f32 %v317_v53, %v316_v32  ;;  %v325_v6 = vadd.f32 %v324_v54, %v323_v33 }
  0x4e   : > { %v283_v7 = vadd.f32 %v282_v60, %v281_v37  ;;  %v290_v8 = vadd.f32 %v289_v61, %v288_v38  ;;  %v332_v9 = vadd.f32 %v331_v62, %v330_v39  ;;  %v360_v56 = vsel %vm359_vm1, %v996_v31, %v358_v50 }
  0x4f   : > { %v297_v57 = vadd.f32 %v296_v63, %v295_v41  ;;  %v339_v10 = vadd.f32 %v338_v0, %v337_v42  ;;  %v361_v11 = vmul.f32 %v360_v56, %v248_v19  ;;  %v362_v12 = vmul.f32 %v360_v56, %v255_v44 }
  0x50   : > { %v346_v58 = vadd.f32 %v345_v1, %v344_v46  ;;  %v353_v13 = vadd.f32 %v352_v2, %v351_v59  ;;  %v363_v14 = vmul.f32 %v360_v56, %v262_v48  ;;  %v364_v15 = vmul.f32 %v360_v56, %v269_v49 }
  0x51   : > { %v369_v16 = vmul.f32 %v360_v56, %v304_v3  ;;  %v370_v17 = vmul.f32 %v360_v56, %v311_v4  ;;  %v371_v18 = vmul.f32 %v360_v56, %v318_v5  ;;  %v372_v20 = vmul.f32 %v360_v56, %v325_v6 }
  0x52   : > { %vm439_vm3 = vcmask 1042434   ;;  %v365_v21 = vmul.f32 %v360_v56, %v276_v55  ;;  %v366_v22 = vmul.f32 %v360_v56, %v283_v7  ;;  %v367_v23 = vmul.f32 %v360_v56, %v290_v8 }
  0x53   : > { %v373_v24 = vmul.f32 %v360_v56, %v332_v9  ;;  %vm441_vm4 = vcmask 1043459   ;;  %v368_v31 = vmul.f32 %v360_v56, %v297_v57  ;;  %v374_v25 = vmul.f32 %v360_v56, %v339_v10 }
  0x54   : > { %v377_v26 = vpack.c.bf16 %v361_v11, %v361_v11  ;;  %v378_v19 = vpack.c.bf16 %v362_v12, %v362_v12  ;;  %vm443_vm5 = vcmask 1044484   ;;  %v375_v27 = vmul.f32 %v360_v56, %v346_v58  ;;  %v712_v58 = vld [vmem:[%s1083_s2] ss:$0 sm:$0xff] }
  0x55   : > { %v376_v28 = vmul.f32 %v360_v56, %v353_v13  ;;  %v379_v29 = vpack.c.bf16 %v363_v14, %v363_v14  ;;  %v380_v30 = vpack.c.bf16 %v364_v15, %v364_v15  ;;  %v385_v32 = vpack.c.bf16 %v369_v16, %v369_v16 }
  0x56   : > { %v386_v33 = vpack.c.bf16 %v370_v17, %v370_v17  ;;  %v387_v34 = vpack.c.bf16 %v371_v18, %v371_v18  ;;  %v388_v35 = vpack.c.bf16 %v372_v20, %v372_v20  ;;  %v381_v36 = vpack.c.bf16 %v365_v21, %v365_v21 }
  0x57   : > { %v382_v37 = vpack.c.bf16 %v366_v22, %v366_v22  ;;  %v383_v38 = vpack.c.bf16 %v367_v23, %v367_v23  ;;  %v389_v39 = vpack.c.bf16 %v373_v24, %v373_v24  ;;  %v384_v40 = vpack.c.bf16 %v368_v31, %v368_v31 }
  0x58   : > { %v390_v41 = vpack.c.bf16 %v374_v25, %v374_v25  ;;  %v421_v42 = vunpack.c.l.b16 %v377_v26  ;;  %v422_v43 = vunpack.c.l.b16 %v378_v19  ;;  %v391_v44 = vpack.c.bf16 %v375_v27, %v375_v27 }
  0x59   : > { %v392_v45 = vpack.c.bf16 %v376_v28, %v376_v28  ;;  %v423_v46 = vunpack.c.l.b16 %v379_v29  ;;  %v424_v51 = vunpack.c.l.b16 %v380_v30  ;;  %v429_v52 = vunpack.c.l.b16 %v385_v32 }
  0x5a   : > { %v430_v53 = vunpack.c.l.b16 %v386_v33  ;;  %v431_v54 = vunpack.c.l.b16 %v387_v34  ;;  %v432_v59 = vunpack.c.l.b16 %v388_v35  ;;  %v425_v60 = vunpack.c.l.b16 %v381_v36 }
  0x5b   : > { %v433_v61 = vunpack.c.l.b16 %v389_v39  ;;  %vm445_vm6 = vcmask 1045509   ;;  %vm447_vm7 = vcmask 1046534   ;;  %v426_v62 = vunpack.c.l.b16 %v382_v37 }
  0x5c   : > { %v434_v47 = vunpack.c.l.b16 %v390_v41  ;;  %v438_v48 = vsel %vm437_vm2, %v422_v43, %v421_v42  ;;  %v451_v49 = vsel %vm437_vm2, %v430_v53, %v429_v52  ;;  %v427_v63 = vunpack.c.l.b16 %v383_v38 }
  0x5d   : > { %v435_v0 = vunpack.c.l.b16 %v391_v44  ;;  %v440_v55 = vsel %vm439_vm3, %v423_v46, %v438_v48  ;;  %v452_v1 = vsel %vm439_vm3, %v431_v54, %v451_v49  ;;  %v428_v2 = vunpack.c.l.b16 %v384_v40 }
  0x5e   : > { %v436_v50 = vunpack.c.l.b16 %v392_v45  ;;  %v442_v3 = vsel %vm441_vm4, %v424_v51, %v440_v55  ;;  %v453_v4 = vsel %vm441_vm4, %v432_v59, %v452_v1  ;;  %vm449_vm8 = vcmask 1047559  }
  0x5f   : > { %v444_v5 = vsel %vm443_vm5, %v425_v60, %v442_v3  ;;  %v454_v6 = vsel %vm443_vm5, %v433_v61, %v453_v4  ;;  %vm483_vm9 = vcmask 523264  }
  0x60   : > { %v446_v7 = vsel %vm445_vm6, %v426_v62, %v444_v5  ;;  %v455_v8 = vsel %vm445_vm6, %v434_v47, %v454_v6 }
  0x61   : > { %v448_v9 = vsel %vm447_vm7, %v427_v63, %v446_v7  ;;  %v456_v56 = vsel %vm447_vm7, %v435_v0, %v455_v8 }
  0x62   : > { %v450_v57 = vsel %vm449_vm8, %v428_v2, %v448_v9  ;;  %v457_v10 = vsel %vm449_vm8, %v436_v50, %v456_v56 }
  0x63   : > { %v458_v11 = vpack.c.b16 %v457_v10, %v450_v57 }
  0x65   : > { %631 = vmatmul.msk.bf16.vlgmr.msra.gmra.mxu0 %vm483_vm9, %v458_v11 }
  0xe2   : > { %v496_v12 = vpop.f32.mrf.mxu0 }
  0xe3   : > { %v497_v14 = vadd.f32 %v712_v58, %v496_v12 }
  0xea   : > { %v498_v13 = vpop.f32.mrf.mxu0 }
  0xeb   : > { %v499_v15 = vadd.f32 %v712_v58, %v498_v13 }
  0xed   : > { %v646_v16 = vpack.c.bf16 %v499_v15, %v497_v14 }
  0xef   : > { %647 = vst [vmem:[%s207_s28] sm:$0xff] %v646_v16  }
  0xf0   : > { %802 = shalt.err (!%p799_p10)
}
  0xf1   : > { %s853_s10 = smov 64   ;;  %s854_s18 = smov 4  }
  0xf2   : > { %654 = dma.vmem_to_hbm [thread:$0]  (%p942_p7), %s519_s29, 128, %s521_s30, %s506_s16, %s853_s10, %s853_s10, %s854_s18  }
  0xf3 PF: > { %s535_s23 = sand.u32 1, %s833_s12   ;;  %p1090_p12 = scmp.ge.s32.totalorder %s845_s15, 2 }
  0xf4   : > { %s536_s17 = scalar_lea.sflag [#allocation4], %s535_s23 }
  0xf5   : > { %p665_p13 = pnand %p1090_p12, %p910_p6 }
  0xf7   : > { %p666_p0 = pneg %p665_p13 }
  0xf9   : > { %828 = dma.done.wait (%p666_p0), %s536_s17, 128  }
  0xfa   : > { %830 = vsyncadd (%p666_p0), %s536_s17, 4294967168  ;;  %p17_p3 = scmp.ge.s32.totalorder %s928_s26, 4   ;;  %s1091_s12 = smov %s837_s13 }
  0xfb   : > { %s1092_s13 = smov %s841_s14  ;;  %s1093_s14 = smov %s938_s4 }
  0xfc   : > { %s1094_s15 = smov %s928_s26  ;;  %19 = sbr.rel (!%p17_p3) target bundleno = 6 (0x6), region = 81 }
 0x101   :  { %542 = vsyncpa [#allocation3], 1 }
 0x102   :  { %544 = vsyncpa [#allocation3 + $0x1], 1 }
 0x103   :  { %545 = vsyncpa [#allocation6], 1 }
 0x104   :  { %546 = vsyncpa [#allocation4], 1 }
 0x105   :  { %548 = vsyncpa [#allocation4 + $0x1], 1 }

</bundles_post_ra>
